<compile_context>
chip_gen: v5e
topology: v5e:2x2
jax: 0.10.0
libtpu: 0.0.40
codegen_flags: <defaults>
</compile_context>

<pallas_src>
import jax
import jax.numpy as jnp
from jax import lax
from jax.experimental import pallas as pl
from jax.experimental.pallas import tpu as pltpu


def critic_kernel(state_ref,
                  w_in_ref, b_in_ref,
                  w1a_ref, b1a_ref, w1b_ref, b1b_ref,
                  w2a_ref, b2a_ref, w2b_ref, b2b_ref,
                  w_out_ref, b_out_ref,
                  out_ref):
    """Fused forward pass; activations are feature-major (hidden, batch_tile)."""
    f32 = jnp.float32
    cdt = w_in_ref.dtype  # MXU operand dtype (bf16 by default)

    # x = relu(W_in @ state^T + b_in)  -> (hidden, Bt)
    # Contraction is on the LAST axis of both operands: state stays in its native
    # (Bt, state_dim) layout; no wrapper-side transpose / extra HBM round-trip.
    s = state_ref[...].astype(cdt)                         # (Bt, state_dim)
    x = lax.dot_general(w_in_ref[...], s,
                        (((1,), (1,)), ((), ())),
                        preferred_element_type=f32)        # (hidden, Bt)
    x = jnp.maximum(x + b_in_ref[...], 0.0)

    def res_block(x, wa_ref, ba_ref, wb_ref, bb_ref):
        h = jnp.dot(wa_ref[...], x.astype(cdt), preferred_element_type=f32)
        h = jnp.maximum(h + ba_ref[...], 0.0)
        h = jnp.dot(wb_ref[...], h.astype(cdt), preferred_element_type=f32)
        h = h + bb_ref[...]
        return jnp.maximum(h + x, 0.0)

    x = res_block(x, w1a_ref, b1a_ref, w1b_ref, b1b_ref)
    x = res_block(x, w2a_ref, b2a_ref, w2b_ref, b2b_ref)

    # Value head: VPU multiply + sublane reduce (avoids an N=1 MXU pass); result
    # is a lane-dense (1, Bt) row with the batch on lanes -> unmasked stores.
    v = jnp.sum(x * w_out_ref[...], axis=0, keepdims=True) + b_out_ref[...]
    out_ref[...] = v.astype(out_ref.dtype)


def _round_up(x, m):
    return ((x + m - 1) // m) * m


def _pick_batch_tile(batch, max_tile):
    """Pick a batch tile: multiple of 256, <= max_tile, clamped to the batch.

    Prefers >= 2 grid tiles whenever the (256-rounded) batch spans them so a
    "parallel" grid axis can place work on both TensorCores (v7x), and balances
    the tile across tiles to minimize padding waste.
    """
    b256 = max(256, _round_up(batch, 256))
    max_tile = max(256, (max_tile // 256) * 256)
    n_tiles = pl.cdiv(b256, max_tile)
    if n_tiles < 2 and b256 >= 512:
        n_tiles = 2
    return _round_up(pl.cdiv(b256, n_tiles), 256)


def _resident_spec(shape):
    """Full-array block with a constant index map: stays VMEM-resident over the grid."""
    rank = len(shape)
    return pl.BlockSpec(shape, lambda i, _r=rank: (0,) * _r)


def critic_forward(state, params, *, batch_tile=4096, weights_dtype=jnp.bfloat16,
                   vmem_limit_bytes=None):
    """Run the fused critic forward pass.

    state:  (B, state_dim) float32
    params: dict from init_params (PyTorch-oriented (out, in) weights, (out, 1) biases)
    Returns (B, 1) float32 values.
    """
    B, state_dim = state.shape
    hidden = params["w_in"].shape[0]

    # Adaptive tile: big enough to amortize grid-step overhead, clamped so small
    # batches don't pad up to a huge tile.
    tile = _pick_batch_tile(B, batch_tile)
    n_tiles = pl.cdiv(B, tile)
    b_pad = n_tiles * tile
    if b_pad != B:
        state = jnp.pad(state, ((0, b_pad - B), (0, 0)))

    wd = weights_dtype
    w_in = params["w_in"].astype(wd)
    w1a = params["w1a"].astype(wd)
    w1b = params["w1b"].astype(wd)
    w2a = params["w2a"].astype(wd)
    w2b = params["w2b"].astype(wd)

    if vmem_limit_bytes is None:
        # Rough live-set estimate: double-buffered (tile, state_dim) state slabs +
        # a handful of f32/bf16 (hidden, tile) activation buffers, plus headroom.
        # Cap at 32 MiB (safe on v5e's 16 MiB scoped default and v7x's 64 MiB VMEM).
        est = 2 * tile * state_dim * 4 + 10 * hidden * tile * 4 + (2 << 20)
        vmem_limit_bytes = int(max(16 << 20, min(_round_up(est, 1 << 20), 32 << 20)))

    in_specs = [
        # State tile in native layout: (tile, state_dim), streamed along the batch grid.
        pl.BlockSpec((tile, state_dim), lambda i: (i, 0)),
        _resident_spec(w_in.shape), _resident_spec(params["b_in"].shape),
        _resident_spec(w1a.shape), _resident_spec(params["b1a"].shape),
        _resident_spec(w1b.shape), _resident_spec(params["b1b"].shape),
        _resident_spec(w2a.shape), _resident_spec(params["b2a"].shape),
        _resident_spec(w2b.shape), _resident_spec(params["b2b"].shape),
        _resident_spec(params["w_out"].shape), _resident_spec(params["b_out"].shape),
    ]
    # Lane-dense output slab: (1, b_pad), batch on lanes; reshaped to (B, 1) below.
    out_spec = pl.BlockSpec((1, tile), lambda i: (0, i))

    out = pl.pallas_call(
        critic_kernel,
        out_shape=jax.ShapeDtypeStruct((1, b_pad), jnp.float32),
        grid=(n_tiles,),
        in_specs=in_specs,
        out_specs=out_spec,
        compiler_params=pltpu.CompilerParams(
            dimension_semantics=("parallel",),      # shards batch tiles across TCs (v7x)
            vmem_limit_bytes=vmem_limit_bytes),
    )(state,
      w_in, params["b_in"],
      w1a, params["b1a"], w1b, params["b1b"],
      w2a, params["b2a"], w2b, params["b2b"],
      params["w_out"], params["b_out"])

    return out.reshape(b_pad, 1)[:B]


def init_params(key, state_dim, hidden_dim=64):
    """PyTorch-style uniform(+/- 1/sqrt(fan_in)) init.

    Weights are stored in the PyTorch orientation (out_features, in_features);
    biases as (out_features, 1) columns; the head weight as (hidden, 1).
    """
    def linear(k, fan_in, fan_out):
        kw, kb = jax.random.split(k)
        bound = 1.0 / jnp.sqrt(jnp.float32(fan_in))
        w = jax.random.uniform(kw, (fan_out, fan_in), jnp.float32, -bound, bound)
        b = jax.random.uniform(kb, (fan_out, 1), jnp.float32, -bound, bound)
        return w, b

    keys = jax.random.split(key, 6)
    w_in, b_in = linear(keys[0], state_dim, hidden_dim)
    w1a, b1a = linear(keys[1], hidden_dim, hidden_dim)
    w1b, b1b = linear(keys[2], hidden_dim, hidden_dim)
    w2a, b2a = linear(keys[3], hidden_dim, hidden_dim)
    w2b, b2b = linear(keys[4], hidden_dim, hidden_dim)
    w_out_po, b_out = linear(keys[5], hidden_dim, 1)      # PyTorch (1, hidden)
    w_out = w_out_po.T                                    # -> (hidden, 1) column for the VPU head
    return dict(w_in=w_in, b_in=b_in,
                w1a=w1a, b1a=b1a, w1b=w1b, b1b=b1b,
                w2a=w2a, b2a=b2a, w2b=w2b, b2b=b2b,
                w_out=w_out, b_out=b_out)


def critic_ref(state, p):
    """Pure-JAX f32 reference mirroring the PyTorch forward exactly."""
    def lin(x, w, b):                      # w: (out, in), b: (out, 1)
        return x @ w.T + b[:, 0]
    x = jnp.maximum(lin(state, p["w_in"], p["b_in"]), 0.0)
    h = jnp.maximum(lin(x, p["w1a"], p["b1a"]), 0.0)
    h = lin(h, p["w1b"], p["b1b"])
    x = jnp.maximum(h + x, 0.0)
    h = jnp.maximum(lin(x, p["w2a"], p["b2a"]), 0.0)
    h = lin(h, p["w2b"], p["b2b"])
    x = jnp.maximum(h + x, 0.0)
    return x @ p["w_out"] + p["b_out"]     # (B, hidden) @ (hidden, 1) + (1, 1)


if __name__ == "__main__":
    key = jax.random.PRNGKey(0)
    k_state, k_params = jax.random.split(key)

    batch = 500          # not a multiple of the tile -> exercises padding + 2-tile grid
    state_dim = 16
    hidden_dim = 64

    state = jax.random.normal(k_state, (batch, state_dim), jnp.float32)
    params = init_params(k_params, state_dim, hidden_dim)

    value = critic_forward(state, params)          # adaptive tile -> 2 tiles of 256
    value = jax.block_until_ready(value)

    ref = critic_ref(state, params)
    assert value.shape == (batch, 1), value.shape
    # bf16 MXU weights/activations vs f32 reference -> relaxed tolerance.
    assert jnp.allclose(value, ref, atol=3e-2, rtol=3e-2), \
        float(jnp.max(jnp.abs(value - ref)))

    print("KERNEL_OK")
</pallas_src>

<mosaic_0001>
module attributes {stable_mosaic.version = 11 : i64} {
  func.func @critic_kernel(%arg0: i32, %arg1: memref<256x16xf32, #tpu.memory_space<vmem>>, %arg2: memref<64x16xbf16, #tpu.memory_space<vmem>>, %arg3: memref<64x1xf32, #tpu.memory_space<vmem>>, %arg4: memref<64x64xbf16, #tpu.memory_space<vmem>>, %arg5: memref<64x1xf32, #tpu.memory_space<vmem>>, %arg6: memref<64x64xbf16, #tpu.memory_space<vmem>>, %arg7: memref<64x1xf32, #tpu.memory_space<vmem>>, %arg8: memref<64x64xbf16, #tpu.memory_space<vmem>>, %arg9: memref<64x1xf32, #tpu.memory_space<vmem>>, %arg10: memref<64x64xbf16, #tpu.memory_space<vmem>>, %arg11: memref<64x1xf32, #tpu.memory_space<vmem>>, %arg12: memref<64x1xf32, #tpu.memory_space<vmem>>, %arg13: memref<1x1xf32, #tpu.memory_space<vmem>>, %arg14: memref<1x256xf32, #tpu.memory_space<vmem>>) attributes {dimension_semantics = [#tpu.dimension_semantics<parallel>], iteration_bounds = array<i64: 2>, scalar_prefetch = 0 : i64, scratch_operands = 0 : i64, tpu.core_type = #tpu.core_type<tc>, window_params = [{transform_indices = @transform_0, window_bounds = array<i64: 256, 16>}, {pipeline_mode = #tpu.pipeline_mode<synchronous>, transform_indices = @transform_1, window_bounds = array<i64: 64, 16>}, {pipeline_mode = #tpu.pipeline_mode<synchronous>, transform_indices = @transform_2, window_bounds = array<i64: 64, 1>}, {pipeline_mode = #tpu.pipeline_mode<synchronous>, transform_indices = @transform_3, window_bounds = array<i64: 64, 64>}, {pipeline_mode = #tpu.pipeline_mode<synchronous>, transform_indices = @transform_4, window_bounds = array<i64: 64, 1>}, {pipeline_mode = #tpu.pipeline_mode<synchronous>, transform_indices = @transform_5, window_bounds = array<i64: 64, 64>}, {pipeline_mode = #tpu.pipeline_mode<synchronous>, transform_indices = @transform_6, window_bounds = array<i64: 64, 1>}, {pipeline_mode = #tpu.pipeline_mode<synchronous>, transform_indices = @transform_7, window_bounds = array<i64: 64, 64>}, {pipeline_mode = #tpu.pipeline_mode<synchronous>, transform_indices = @transform_8, window_bounds = array<i64: 64, 1>}, {pipeline_mode = #tpu.pipeline_mode<synchronous>, transform_indices = @transform_9, window_bounds = array<i64: 64, 64>}, {pipeline_mode = #tpu.pipeline_mode<synchronous>, transform_indices = @transform_10, window_bounds = array<i64: 64, 1>}, {pipeline_mode = #tpu.pipeline_mode<synchronous>, transform_indices = @transform_11, window_bounds = array<i64: 64, 1>}, {pipeline_mode = #tpu.pipeline_mode<synchronous>, transform_indices = @transform_12, window_bounds = array<i64: 1, 1>}, {transform_indices = @transform_13, window_bounds = array<i64: 1, 256>}]} {
    %c0 = arith.constant 0 : index
    %c0_0 = arith.constant 0 : index
    %0 = vector.load %arg1[%c0, %c0_0] : memref<256x16xf32, #tpu.memory_space<vmem>>, vector<256x16xf32>
    %1 = arith.truncf %0 : vector<256x16xf32> to vector<256x16xbf16>
    %c0_1 = arith.constant 0 : index
    %c0_2 = arith.constant 0 : index
    %2 = vector.load %arg2[%c0_1, %c0_2] : memref<64x16xbf16, #tpu.memory_space<vmem>>, vector<64x16xbf16>
    %cst = arith.constant dense<0.000000e+00> : vector<64x256xf32>
    %3 = tpu.matmul %2, %1, %cst {dimension_numbers = #tpu.dot_dimension_numbers<[1], [1], [0], [0], [0, 0, 1, 0], [], []>} : vector<64x16xbf16>, vector<256x16xbf16>, vector<64x256xf32> -> vector<64x256xf32>
    %c0_3 = arith.constant 0 : index
    %c0_4 = arith.constant 0 : index
    %4 = vector.load %arg3[%c0_3, %c0_4] : memref<64x1xf32, #tpu.memory_space<vmem>>, vector<64x1xf32>
    %5 = vector.broadcast %4 : vector<64x1xf32> to vector<64x256xf32>
    %6 = arith.addf %3, %5 : vector<64x256xf32>
    %cst_5 = arith.constant 0.000000e+00 : f32
    %7 = vector.broadcast %cst_5 : f32 to vector<64x256xf32>
    %8 = arith.maximumf %6, %7 : vector<64x256xf32>
    %c0_6 = arith.constant 0 : index
    %c0_7 = arith.constant 0 : index
    %9 = vector.load %arg4[%c0_6, %c0_7] : memref<64x64xbf16, #tpu.memory_space<vmem>>, vector<64x64xbf16>
    %10 = arith.truncf %8 : vector<64x256xf32> to vector<64x256xbf16>
    %cst_8 = arith.constant dense<0.000000e+00> : vector<64x256xf32>
    %11 = tpu.matmul %9, %10, %cst_8 {dimension_numbers = #tpu.dot_dimension_numbers<[1], [0], [0], [1], [0, 0, 1, 1], [], []>} : vector<64x64xbf16>, vector<64x256xbf16>, vector<64x256xf32> -> vector<64x256xf32>
    %c0_9 = arith.constant 0 : index
    %c0_10 = arith.constant 0 : index
    %12 = vector.load %arg5[%c0_9, %c0_10] : memref<64x1xf32, #tpu.memory_space<vmem>>, vector<64x1xf32>
    %13 = vector.broadcast %12 : vector<64x1xf32> to vector<64x256xf32>
    %14 = arith.addf %11, %13 : vector<64x256xf32>
    %cst_11 = arith.constant 0.000000e+00 : f32
    %15 = vector.broadcast %cst_11 : f32 to vector<64x256xf32>
    %16 = arith.maximumf %14, %15 : vector<64x256xf32>
    %c0_12 = arith.constant 0 : index
    %c0_13 = arith.constant 0 : index
    %17 = vector.load %arg6[%c0_12, %c0_13] : memref<64x64xbf16, #tpu.memory_space<vmem>>, vector<64x64xbf16>
    %18 = arith.truncf %16 : vector<64x256xf32> to vector<64x256xbf16>
    %cst_14 = arith.constant dense<0.000000e+00> : vector<64x256xf32>
    %19 = tpu.matmul %17, %18, %cst_14 {dimension_numbers = #tpu.dot_dimension_numbers<[1], [0], [0], [1], [0, 0, 1, 1], [], []>} : vector<64x64xbf16>, vector<64x256xbf16>, vector<64x256xf32> -> vector<64x256xf32>
    %c0_15 = arith.constant 0 : index
    %c0_16 = arith.constant 0 : index
    %20 = vector.load %arg7[%c0_15, %c0_16] : memref<64x1xf32, #tpu.memory_space<vmem>>, vector<64x1xf32>
    %21 = vector.broadcast %20 : vector<64x1xf32> to vector<64x256xf32>
    %22 = arith.addf %19, %21 : vector<64x256xf32>
    %23 = arith.addf %22, %8 : vector<64x256xf32>
    %cst_17 = arith.constant 0.000000e+00 : f32
    %24 = vector.broadcast %cst_17 : f32 to vector<64x256xf32>
    %25 = arith.maximumf %23, %24 : vector<64x256xf32>
    %c0_18 = arith.constant 0 : index
    %c0_19 = arith.constant 0 : index
    %26 = vector.load %arg8[%c0_18, %c0_19] : memref<64x64xbf16, #tpu.memory_space<vmem>>, vector<64x64xbf16>
    %27 = arith.truncf %25 : vector<64x256xf32> to vector<64x256xbf16>
    %cst_20 = arith.constant dense<0.000000e+00> : vector<64x256xf32>
    %28 = tpu.matmul %26, %27, %cst_20 {dimension_numbers = #tpu.dot_dimension_numbers<[1], [0], [0], [1], [0, 0, 1, 1], [], []>} : vector<64x64xbf16>, vector<64x256xbf16>, vector<64x256xf32> -> vector<64x256xf32>
    %c0_21 = arith.constant 0 : index
    %c0_22 = arith.constant 0 : index
    %29 = vector.load %arg9[%c0_21, %c0_22] : memref<64x1xf32, #tpu.memory_space<vmem>>, vector<64x1xf32>
    %30 = vector.broadcast %29 : vector<64x1xf32> to vector<64x256xf32>
    %31 = arith.addf %28, %30 : vector<64x256xf32>
    %cst_23 = arith.constant 0.000000e+00 : f32
    %32 = vector.broadcast %cst_23 : f32 to vector<64x256xf32>
    %33 = arith.maximumf %31, %32 : vector<64x256xf32>
    %c0_24 = arith.constant 0 : index
    %c0_25 = arith.constant 0 : index
    %34 = vector.load %arg10[%c0_24, %c0_25] : memref<64x64xbf16, #tpu.memory_space<vmem>>, vector<64x64xbf16>
    %35 = arith.truncf %33 : vector<64x256xf32> to vector<64x256xbf16>
    %cst_26 = arith.constant dense<0.000000e+00> : vector<64x256xf32>
    %36 = tpu.matmul %34, %35, %cst_26 {dimension_numbers = #tpu.dot_dimension_numbers<[1], [0], [0], [1], [0, 0, 1, 1], [], []>} : vector<64x64xbf16>, vector<64x256xbf16>, vector<64x256xf32> -> vector<64x256xf32>
    %c0_27 = arith.constant 0 : index
    %c0_28 = arith.constant 0 : index
    %37 = vector.load %arg11[%c0_27, %c0_28] : memref<64x1xf32, #tpu.memory_space<vmem>>, vector<64x1xf32>
    %38 = vector.broadcast %37 : vector<64x1xf32> to vector<64x256xf32>
    %39 = arith.addf %36, %38 : vector<64x256xf32>
    %40 = arith.addf %39, %25 : vector<64x256xf32>
    %cst_29 = arith.constant 0.000000e+00 : f32
    %41 = vector.broadcast %cst_29 : f32 to vector<64x256xf32>
    %42 = arith.maximumf %40, %41 : vector<64x256xf32>
    %c0_30 = arith.constant 0 : index
    %c0_31 = arith.constant 0 : index
    %43 = vector.load %arg12[%c0_30, %c0_31] : memref<64x1xf32, #tpu.memory_space<vmem>>, vector<64x1xf32>
    %44 = vector.broadcast %43 : vector<64x1xf32> to vector<64x256xf32>
    %45 = arith.mulf %42, %44 : vector<64x256xf32>
    %cst_32 = arith.constant dense<0.000000e+00> : vector<256xf32>
    %46 = vector.multi_reduction <add>, %45, %cst_32 [0] : vector<64x256xf32> to vector<256xf32>
    %47 = vector.shape_cast %46 : vector<256xf32> to vector<1x256xf32>
    %c0_33 = arith.constant 0 : index
    %c0_34 = arith.constant 0 : index
    %48 = vector.load %arg13[%c0_33, %c0_34] : memref<1x1xf32, #tpu.memory_space<vmem>>, vector<1x1xf32>
    %49 = vector.broadcast %48 : vector<1x1xf32> to vector<1x256xf32>
    %50 = arith.addf %47, %49 : vector<1x256xf32>
    %c0_35 = arith.constant 0 : index
    %c0_36 = arith.constant 0 : index
    %51 = vector.load %arg14[%c0_35, %c0_36] : memref<1x256xf32, #tpu.memory_space<vmem>>, vector<1x256xf32>
    tpu.vector_store %arg14[%c0_35, %c0_36], %50 {strides = array<i32>} : memref<1x256xf32, #tpu.memory_space<vmem>>, vector<1x256xf32>,
    return
  }
  func.func @transform_0(%arg0: i32) -> (i32, i32) {
    %c0_i32 = arith.constant 0 : i32
    %c0_i32_0 = arith.constant 0 : i32
    return %arg0, %c0_i32 : i32, i32
  }
  func.func @transform_1(%arg0: i32) -> (i32, i32) {
    %c0_i32 = arith.constant 0 : i32
    %c0_i32_0 = arith.constant 0 : i32
    %c0_i32_1 = arith.constant 0 : i32
    return %c0_i32, %c0_i32_0 : i32, i32
  }
  func.func @transform_2(%arg0: i32) -> (i32, i32) {
    %c0_i32 = arith.constant 0 : i32
    %c0_i32_0 = arith.constant 0 : i32
    %c0_i32_1 = arith.constant 0 : i32
    return %c0_i32, %c0_i32_0 : i32, i32
  }
  func.func @transform_3(%arg0: i32) -> (i32, i32) {
    %c0_i32 = arith.constant 0 : i32
    %c0_i32_0 = arith.constant 0 : i32
    %c0_i32_1 = arith.constant 0 : i32
    return %c0_i32, %c0_i32_0 : i32, i32
  }
  func.func @transform_4(%arg0: i32) -> (i32, i32) {
    %c0_i32 = arith.constant 0 : i32
    %c0_i32_0 = arith.constant 0 : i32
    %c0_i32_1 = arith.constant 0 : i32
    return %c0_i32, %c0_i32_0 : i32, i32
  }
  func.func @transform_5(%arg0: i32) -> (i32, i32) {
    %c0_i32 = arith.constant 0 : i32
    %c0_i32_0 = arith.constant 0 : i32
    %c0_i32_1 = arith.constant 0 : i32
    return %c0_i32, %c0_i32_0 : i32, i32
  }
  func.func @transform_6(%arg0: i32) -> (i32, i32) {
    %c0_i32 = arith.constant 0 : i32
    %c0_i32_0 = arith.constant 0 : i32
    %c0_i32_1 = arith.constant 0 : i32
    return %c0_i32, %c0_i32_0 : i32, i32
  }
  func.func @transform_7(%arg0: i32) -> (i32, i32) {
    %c0_i32 = arith.constant 0 : i32
    %c0_i32_0 = arith.constant 0 : i32
    %c0_i32_1 = arith.constant 0 : i32
    return %c0_i32, %c0_i32_0 : i32, i32
  }
  func.func @transform_8(%arg0: i32) -> (i32, i32) {
    %c0_i32 = arith.constant 0 : i32
    %c0_i32_0 = arith.constant 0 : i32
    %c0_i32_1 = arith.constant 0 : i32
    return %c0_i32, %c0_i32_0 : i32, i32
  }
  func.func @transform_9(%arg0: i32) -> (i32, i32) {
    %c0_i32 = arith.constant 0 : i32
    %c0_i32_0 = arith.constant 0 : i32
    %c0_i32_1 = arith.constant 0 : i32
    return %c0_i32, %c0_i32_0 : i32, i32
  }
  func.func @transform_10(%arg0: i32) -> (i32, i32) {
    %c0_i32 = arith.constant 0 : i32
    %c0_i32_0 = arith.constant 0 : i32
    %c0_i32_1 = arith.constant 0 : i32
    return %c0_i32, %c0_i32_0 : i32, i32
  }
  func.func @transform_11(%arg0: i32) -> (i32, i32) {
    %c0_i32 = arith.constant 0 : i32
    %c0_i32_0 = arith.constant 0 : i32
    %c0_i32_1 = arith.constant 0 : i32
    return %c0_i32, %c0_i32_0 : i32, i32
  }
  func.func @transform_12(%arg0: i32) -> (i32, i32) {
    %c0_i32 = arith.constant 0 : i32
    %c0_i32_0 = arith.constant 0 : i32
    %c0_i32_1 = arith.constant 0 : i32
    return %c0_i32, %c0_i32_0 : i32, i32
  }
  func.func @transform_13(%arg0: i32) -> (i32, i32) {
    %c0_i32 = arith.constant 0 : i32
    %c0_i32_0 = arith.constant 0 : i32
    return %c0_i32, %arg0 : i32, i32
  }
}

</mosaic_0001>

<bundles_post_ra>
// kernel: tpu_custom_call.1
= control target key start
LH: loop header
LB: loop body
LE: loop exit
PB: predicated region body
PF: predicated region fallthrough
CT: control target
= control target key end

     0   :  { %s2536_s0 = inlined_call_operand.vmem [shape: f32[512,16], index: 0, kind: input, shape index: {}]   ;;  %s2537_s1 = inlined_call_operand.vmem [shape: bf16[64,16], index: 1, kind: input, shape index: {}]   ;;  %s2538_s2 = inlined_call_operand.vmem [shape: f32[64,1], index: 2, kind: input, shape index: {}]   ;;  %s2539_s3 = inlined_call_operand.vmem [shape: bf16[64,64], index: 3, kind: input, shape index: {}]   ;;  %s2540_s4 = inlined_call_operand.vmem [shape: f32[64,1], index: 4, kind: input, shape index: {}]   ;;  %s2541_s5 = inlined_call_operand.vmem [shape: bf16[64,64], index: 5, kind: input, shape index: {}]   ;;  %s2542_s6 = inlined_call_operand.vmem [shape: f32[64,1], index: 6, kind: input, shape index: {}]   ;;  %s2543_s7 = inlined_call_operand.vmem [shape: bf16[64,64], index: 7, kind: input, shape index: {}]   ;;  %s2544_s8 = inlined_call_operand.vmem [shape: f32[64,1], index: 8, kind: input, shape index: {}]   ;;  %s2545_s9 = inlined_call_operand.vmem [shape: bf16[64,64], index: 9, kind: input, shape index: {}]   ;;  %s2546_s10 = inlined_call_operand.vmem [shape: f32[64,1], index: 10, kind: input, shape index: {}]   ;;  %s2547_s11 = inlined_call_operand.vmem [shape: f32[64,1], index: 11, kind: input, shape index: {}]   ;;  %s2548_s12 = inlined_call_operand.<no memory space> [shape: f32[1,1], index: 12, kind: input, shape index: {}]   ;;  %s2549_s13 = inlined_call_operand.hbm [shape: f32[1,512], index: 13, kind: output, shape index: {}]  }
   0x1   :  { %2564 = sst [smem:[#allocation6_spill]] %s2536_s0  ;;  %v18_v0 = vstv %s2548_s12 }
   0x2   :  { %2565 = sst [smem:[#allocation7_spill]] %s2537_s1  ;;  %19 = vst [vmem:[#allocation2] sm:$0x1] %v18_v0 }
   0x3   :  { %20 = vsyncpa [#allocation4], 0 }
   0x4   :  { %22 = vsyncpa [#allocation4 + $0x1], 0  ;;  %s1934_s27 = smov 0   ;;  %s1936_s28 = smov 0  }
   0x5   :  { %s1938_s29 = smov 0   ;;  %s1940_s30 = smov 0  }
   0x6 LB: > { %s1955_s12 = sadd.s32 4294967295, %s1858_s30   ;;  %s1602_s14 = sadd.s32 4294967294, %s1858_s30   ;;  %s1858_s30 = sphi %s1940_s30, %s2587_s30   ;;  %s1854_s29 = sphi %s1938_s29, %s2586_s29   ;;  %s1850_s28 = sphi %s1936_s28, %s2585_s28   ;;  %s1846_s27 = sphi %s1934_s27, %s2584_s27  }
   0x7   : > { %s1959_s15 = sadd.s32 1, %s1858_s30   ;;  %s313_s16 = sadd.s32 1, %s1854_s29 }
   0x8   : > { %s310_s17 = ssub.s32 %s1858_s30, %s1959_s15  ;;  %p323_p0 = scmp.ne.s32.totalorder %s1854_s29, %s1850_s28 }
   0x9   : > { %p311_p1 = scmp.eq.s32.totalorder %s310_s17, 0  ;;  %p324_p2 = scmp.eq.s32.totalorder %s1955_s12, 1 }
   0xa   : > { %p329_p3 = scmp.ne.s32.totalorder %s1850_s28, %s1846_s27  ;;  %p330_p4 = scmp.eq.s32.totalorder %s1602_s14, 1 }
   0xb   : > { %s1970_s18 = scalar_select %p311_p1, %s1854_s29, %s313_s16  }
   0xc   : > { %p1972_p5 = por %p324_p2, %p323_p0  ;;  %p1976_p6 = por %p330_p4, %p329_p3 }
   0xd   : > { %p1605_p7 = scmp.ge.s32.totalorder %s1858_s30, 1  ;;  %p393_p8 = scmp.lt.s32.totalorder %s1858_s30, 3 }
   0xf   : > { %p394_p9 = pnand %p1605_p7, %p393_p8 }
  0x10   : > { %s1607_s23 = sshll.u32 (!%p394_p9), %s1955_s12, 5  ;;  %s2568_s0 = sld [smem:[#allocation6_spill]] (!%p394_p9) }
  0x11   : > { %397 = sbr.rel (%p394_p9) target bundleno = 1137 (0x471), region = 72  ;;  %p438_p10 = scmp.lt.s32.totalorder (!%p394_p9), %s1607_s23, 63 }
  0x12   : > { %s2569_s1 = sld [smem:[#allocation7_spill]] (!%p394_p9)  ;;  %s434_s25 = sand.u32 (!%p394_p9), 1, %s1850_s28  }
  0x13   : > { %s1816_s14 = scalar_lea.hbm (!%p394_p9), %s2549_s13, 4 }
  0x16   : > { %v507_v1 = vld [vmem:[%s2538_s2 + $0x30] sm:$0xff]  ;;  %v505_v2 = vld [vmem:[%s2538_s2 + $0x20] sm:$0xff]  ;;  %v1860_v3 = vmov 0   ;;  %s2589_s23 = smov (!%p438_p10, %s1607_s23), 63  ;;  %v508_v4 = vld [vmem:[%s2538_s2 + $0x38] sm:$0xff]  ;;  %vm569_vm0 = vcmask 130048  }
  0x17   : > { %1793 = vset.pattern.permute.xlu0 %v1860_v3  ;;  %1794 = vset.pattern.permute.xlu1 %v1860_v3  ;;  %s1608_s26 = sshll.u32 %s2589_s23, 3  ;;  %v506_v5 = vld [vmem:[%s2538_s2 + $0x28] sm:$0xff]  ;;  %v503_v20 = vld [vmem:[%s2538_s2 + $0x10] sm:$0xff]  ;;  %v501_v21 = vld [vmem:[%s2538_s2] sm:$0xff]  ;;  %vm788_vm1 = vcmask 523264   ;;  %s1606_s23 = sshll.u32 %s434_s25, 1 }
  0x18   : > { %541 = vperm.xlu0 %1793, %v507_v1   ;;  %531 = vperm.xlu1 %1794, %v505_v2   ;;  %s1992_s17 = scalar_lea.vmem %s2568_s0, %s1608_s26  ;;  %v502_v22 = vld [vmem:[%s2538_s2 + $0x8] sm:$0xff]  ;;  %v504_v30 = vld [vmem:[%s2538_s2 + $0x18] sm:$0xff]  ;;  %v724_v33 = vld [vmem:[%s2540_s4 + $0x20] sm:$0xff]  ;;  %s1730_s26 = sshll.u32 %s1955_s12, 1  ;;  %vm1519_vm2 = vcmask 1040384  }
  0x19   : > { %1795 = vset.pattern.permute.xlu2 %v1860_v3  ;;  %v459_v6 = vld [vmem:[%s1992_s17 + $0x70] sm:$0xff]  ;;  %v460_v7 = vld [vmem:[%s1992_s17 + $0x78] sm:$0xff]  ;;  %v457_v12 = vld [vmem:[%s1992_s17 + $0x60] sm:$0xff]  ;;  %s1538_s16 = scalar_lea.hbm %s2549_s13, %s1730_s26  ;;  %s436_s21 = scalar_lea.vmem [#allocation3], %s1606_s23 }
  0x1a   : > { %v475_v8 = vld [vmem:[%s1992_s17 + $0xf0] sm:$0xff]  ;;  %v484_v9 = vpack.c.bf16 %v460_v7, %v459_v6  ;;  %v476_v10 = vld [vmem:[%s1992_s17 + $0xf8] sm:$0xff]  ;;  %v458_v13 = vld [vmem:[%s1992_s17 + $0x68] sm:$0xff]  ;;  %521 = vperm.xlu2 %1795, %v503_v20   ;;  %s1540_s22 = sshll.u32 %s436_s21, 4  ;;  %s1542_s0 = sshll.u32 %s1538_s16, 4  ;;  %s1541_s22 = int_to_ptr.vmem [resolvable:$true] %s1540_s22  ;;  %s1543_s0 = int_to_ptr.hbm [resolvable:$true] %s1542_s0 }
  0x1b   : > { %v492_v11 = vpack.c.bf16 %v476_v10, %v475_v8  ;;  %v473_v15 = vld [vmem:[%s1992_s17 + $0xe0] sm:$0xff]  ;;  %v474_v16 = vld [vmem:[%s1992_s17 + $0xe8] sm:$0xff]  ;;  %v483_v18 = vpack.c.bf16 %v458_v13, %v457_v12  ;;  %v455_v25 = vld [vmem:[%s1992_s17 + $0x50] sm:$0xff]  ;;  %s1528_s12 = scalar_lea.sflag [#allocation4], %s434_s25  ;;  %s1810_s24 = sshra.s32 %s1543_s0, 4  ;;  %s1811_s24 = int_to_ptr.hbm [resolvable:$true] %s1810_s24 }
  0x1c   : > { %v604_v14 = vsel %vm569_vm0, %v484_v9, 0  ;;  %v491_v19 = vpack.c.bf16 %v474_v16, %v473_v15  ;;  %v456_v26 = vld [vmem:[%s1992_s17 + $0x58] sm:$0xff]  ;;  %v471_v27 = vld [vmem:[%s1992_s17 + $0xd0] sm:$0xff]  ;;  %v453_v36 = vld [vmem:[%s1992_s17 + $0x40] sm:$0xff]  ;;  %s1812_s26 = scalar_lea.hbm %s1811_s24, 2  ;;  %p1817_p0 = scmp.lt.s32.totalorder %s1811_s24, %s2549_s13 }
  0x1d   : > { %630 = vmatpush.bf16.xpose.msra.mxu0 %v604_v14  ;;  %v628_v17 = vsel %vm569_vm0, %v492_v11, 0  ;;  %v601_v23 = vsel %vm569_vm0, %v483_v18, 0  ;;  %v472_v28 = vld [vmem:[%s1992_s17 + $0xd8] sm:$0xff]  ;;  %v482_v29 = vpack.c.bf16 %v456_v26, %v455_v25  ;;  %v454_v37 = vld [vmem:[%s1992_s17 + $0x48] sm:$0xff]  ;;  %v469_v38 = vld [vmem:[%s1992_s17 + $0xc0] sm:$0xff]  ;;  %p1813_p11 = scmp.ne.s32.totalorder %s1811_s24, %s1812_s26  ;;  %p1818_p1 = scmp.lt.s32.totalorder %s1816_s14, %s1812_s26 }
  0x1e   : > { %659 = vmatpush.bf16.xpose.msra.mxu1 %v628_v17  ;;  %v625_v24 = vsel %vm569_vm0, %v491_v19, 0  ;;  %v490_v31 = vpack.c.bf16 %v472_v28, %v471_v27  ;;  %v727_v32 = vld [vmem:[%s2540_s4 + $0x38] sm:$0xff]  ;;  %v470_v39 = vld [vmem:[%s1992_s17 + $0xc8] sm:$0xff]  ;;  %v481_v40 = vpack.c.bf16 %v454_v37, %v453_v36  ;;  %v726_v41 = vld [vmem:[%s2540_s4 + $0x30] sm:$0xff] }
  0x1f   : > { %v598_v34 = vsel %vm569_vm0, %v482_v29, 0  ;;  %v489_v42 = vpack.c.bf16 %v470_v39, %v469_v38  ;;  %v722_v43 = vld [vmem:[%s2540_s4 + $0x10] sm:$0xff]  ;;  %v723_v44 = vld [vmem:[%s2540_s4 + $0x18] sm:$0xff]  ;;  %v725_v52 = vld [vmem:[%s2540_s4 + $0x28] sm:$0xff]  ;;  %p1814_p12 = pnand %p1813_p11, %p1972_p5  ;;  %p1819_p2 = por %p1818_p1, %p1817_p0 }
  0x20   : > { %546 = vperm.xlu0 %1793, %v508_v4   ;;  %536 = vperm.xlu1 %1794, %v506_v5   ;;  %v622_v35 = vsel %vm569_vm0, %v490_v31, 0  ;;  %v595_v45 = vsel %vm569_vm0, %v481_v40, 0  ;;  %v451_v47 = vld [vmem:[%s1992_s17 + $0x30] sm:$0xff]  ;;  %v452_v48 = vld [vmem:[%s1992_s17 + $0x38] sm:$0xff]  ;;  %v721_v54 = vld [vmem:[%s2540_s4 + $0x8] sm:$0xff] }
  0x21   : > { %v619_v46 = vsel %vm569_vm0, %v489_v42, 0  ;;  %v467_v49 = vld [vmem:[%s1992_s17 + $0xb0] sm:$0xff]  ;;  %v468_v50 = vld [vmem:[%s1992_s17 + $0xb8] sm:$0xff]  ;;  %v480_v51 = vpack.c.bf16 %v452_v48, %v451_v47  ;;  %v449_v58 = vld [vmem:[%s1992_s17 + $0x20] sm:$0xff]  ;;  %p1815_p13 = pneg %p1814_p12 }
  0x22   : > { %526 = vperm.xlu2 %1795, %v504_v30   ;;  %v488_v53 = vpack.c.bf16 %v468_v50, %v467_v49  ;;  %v897_v55 = vld [vmem:[%s2542_s6 + $0x30] sm:$0xff]  ;;  %v450_v59 = vld [vmem:[%s1992_s17 + $0x28] sm:$0xff]  ;;  %v465_v60 = vld [vmem:[%s1992_s17 + $0xa0] sm:$0xff] }
  0x23   : > { %v592_v56 = vsel %vm569_vm0, %v480_v51, 0  ;;  %v466_v61 = vld [vmem:[%s1992_s17 + $0xa8] sm:$0xff]  ;;  %v720_v62 = vld [vmem:[%s2540_s4] sm:$0xff]  ;;  %v479_v63 = vpack.c.bf16 %v450_v59, %v449_v58  ;;  %v447_v5 = vld [vmem:[%s1992_s17 + $0x10] sm:$0xff]  ;;  %p1820_p3 = pnand %p1819_p2, %p1815_p13 }
  0x24   : > { %v616_v57 = vsel %vm569_vm0, %v488_v53, 0  ;;  %v487_v0 = vpack.c.bf16 %v466_v61, %v465_v60  ;;  %v895_v1 = vld [vmem:[%s2542_s6 + $0x20] sm:$0xff]  ;;  %v896_v2 = vld [vmem:[%s2542_s6 + $0x28] sm:$0xff]  ;;  %v448_v6 = vld [vmem:[%s1992_s17 + $0x18] sm:$0xff] }
  0x25   : > { %631 = vmatpush.bf16.xpose.msra.mxu0 %v601_v23  ;;  %v589_v3 = vsel %vm569_vm0, %v479_v63, 0  ;;  %v463_v7 = vld [vmem:[%s1992_s17 + $0x90] sm:$0xff]  ;;  %v464_v8 = vld [vmem:[%s1992_s17 + $0x98] sm:$0xff]  ;;  %v478_v10 = vpack.c.bf16 %v448_v6, %v447_v5  ;;  %v891_v13 = vld [vmem:[%s2542_s6] sm:$0xff] }
  0x26   : > { %660 = vmatpush.bf16.xpose.msra.mxu1 %v625_v24  ;;  %v613_v4 = vsel %vm569_vm0, %v487_v0, 0  ;;  %v898_v9 = vld [vmem:[%s2542_s6 + $0x38] sm:$0xff]  ;;  %v486_v11 = vpack.c.bf16 %v464_v8, %v463_v7  ;;  %v445_v16 = vld [vmem:[%s1992_s17] sm:$0xff]  ;;  %v446_v17 = vld [vmem:[%s1992_s17 + $0x8] sm:$0xff] }
  0x27   : > { %v894_v12 = vld [vmem:[%s2542_s6 + $0x18] sm:$0xff]  ;;  %v586_v14 = vsel %vm569_vm0, %v478_v10, 0  ;;  %v461_v18 = vld [vmem:[%s1992_s17 + $0x80] sm:$0xff]  ;;  %v462_v19 = vld [vmem:[%s1992_s17 + $0x88] sm:$0xff] }
  0x28   : > { %511 = vperm.xlu0 %1793, %v501_v21   ;;  %516 = vperm.xlu1 %1794, %v502_v22   ;;  %v610_v15 = vsel %vm569_vm0, %v486_v11, 0  ;;  %v893_v20 = vld [vmem:[%s2542_s6 + $0x10] sm:$0xff]  ;;  %v477_v21 = vpack.c.bf16 %v446_v17, %v445_v16  ;;  %v485_v22 = vpack.c.bf16 %v462_v19, %v461_v18  ;;  %v1084_v24 = vld [vmem:[%s2544_s8 + $0x38] sm:$0xff]  ;;  %v892_v27 = vld [vmem:[%s2542_s6 + $0x8] sm:$0xff] }
  0x29   : > { %v1083_v23 = vld [vmem:[%s2544_s8 + $0x30] sm:$0xff]  ;;  %v1733_v28 = vld [vmem:[%s2569_s1] sm:$0xff]  ;;  %v1082_v29 = vld [vmem:[%s2544_s8 + $0x28] sm:$0xff] }
  0x2a   : > { %760 = vperm.xlu2 %1795, %v726_v41   ;;  %v583_v25 = vsel %vm569_vm0, %v477_v21, 0  ;;  %v607_v26 = vsel %vm569_vm0, %v485_v22, 0  ;;  %v1079_v30 = vld [vmem:[%s2544_s8 + $0x10] sm:$0xff]  ;;  %v1081_v31 = vld [vmem:[%s2544_s8 + $0x20] sm:$0xff]  ;;  %v1248_v36 = vld [vmem:[%s2546_s10 + $0x8] sm:$0xff] }
  0x2b   : > { %v1249_v37 = vld [vmem:[%s2546_s10 + $0x10] sm:$0xff]  ;;  %v1247_v38 = vld [vmem:[%s2546_s10] sm:$0xff]  ;;  %v1250_v41 = vld [vmem:[%s2546_s10 + $0x18] sm:$0xff] }
  0x2c   : > { %v1251_v39 = vld [vmem:[%s2546_s10 + $0x20] sm:$0xff]  ;;  %v1735_v42 = vld [vmem:[%s2569_s1 + $0x10] sm:$0xff]  ;;  %v1254_v47 = vld [vmem:[%s2546_s10 + $0x38] sm:$0xff] }
  0x2d   : > { %632 = vmatpush.bf16.xpose.msra.mxu0 %v598_v34  ;;  %v1080_v34 = vld [vmem:[%s2544_s8 + $0x18] sm:$0xff]  ;;  %v1417_v40 = vld [vmem:[%s2547_s11] sm:$0xff]  ;;  %v1253_v48 = vld [vmem:[%s2546_s10 + $0x30] sm:$0xff] }
  0x2e   : > { %661 = vmatpush.bf16.xpose.msra.mxu1 %v622_v35  ;;  %v1734_v35 = vld [vmem:[%s2569_s1 + $0x8] sm:$0xff]  ;;  %v1736_v49 = vld [vmem:[%s2569_s1 + $0x18] sm:$0xff]  ;;  %v1423_v51 = vld [vmem:[%s2547_s11 + $0x30] sm:$0xff] }
  0x2f   : > { %v1422_v50 = vld [vmem:[%s2547_s11 + $0x28] sm:$0xff]  ;;  %v1507_v53 = vld [vmem:[#allocation2] sm:$0x1] }
  0x30   : > { %765 = vperm.xlu0 %1793, %v727_v32   ;;  %750 = vperm.xlu1 %1794, %v724_v33   ;;  %v1077_v32 = vld [vmem:[%s2544_s8] sm:$0xff]  ;;  %v1078_v33 = vld [vmem:[%s2544_s8 + $0x8] sm:$0xff] }
  0x32   : > { %755 = vperm.xlu2 %1795, %v725_v52   ;;  %v1421_v52 = vld [vmem:[%s2547_s11 + $0x20] sm:$0xff] }
  0x35   : > { %633 = vmatpush.bf16.xpose.msra.mxu0 %v595_v45  ;;  %v1418_v45 = vld [vmem:[%s2547_s11 + $0x8] sm:$0xff] }
  0x36   : > { %662 = vmatpush.bf16.xpose.msra.mxu1 %v619_v46  ;;  %v1420_v46 = vld [vmem:[%s2547_s11 + $0x18] sm:$0xff] }
  0x38   : > { %740 = vperm.xlu0 %1793, %v722_v43   ;;  %745 = vperm.xlu1 %1794, %v723_v44   ;;  %v1252_v43 = vld [vmem:[%s2546_s10 + $0x28] sm:$0xff]  ;;  %v1419_v44 = vld [vmem:[%s2547_s11 + $0x10] sm:$0xff] }
  0x3a   : > { %730 = vperm.xlu2 %1795, %v720_v62  }
  0x3d   : > { %634 = vmatpush.bf16.xpose.msra.mxu0 %v592_v56 }
  0x3e   : > { %663 = vmatpush.bf16.xpose.msra.mxu1 %v616_v57 }
  0x40   : > { %735 = vperm.xlu0 %1793, %v721_v54   ;;  %931 = vperm.xlu1 %1794, %v897_v55   ;;  %v1424_v54 = vld [vmem:[%s2547_s11 + $0x38] sm:$0xff] }
  0x42   : > { %936 = vperm.xlu2 %1795, %v898_v9  }
  0x45   : > { %635 = vmatpush.bf16.xpose.msra.mxu0 %v589_v3 }
  0x46   : > { %664 = vmatpush.bf16.xpose.msra.mxu1 %v613_v4 }
  0x48   : > { %921 = vperm.xlu0 %1793, %v895_v1   ;;  %926 = vperm.xlu1 %1794, %v896_v2  }
  0x4a   : > { %911 = vperm.xlu2 %1795, %v893_v20  }
  0x4d   : > { %636 = vmatpush.bf16.xpose.msra.mxu0 %v586_v14 }
  0x4e   : > { %665 = vmatpush.bf16.xpose.msra.mxu1 %v610_v15 }
  0x50   : > { %916 = vperm.xlu0 %1793, %v894_v12   ;;  %901 = vperm.xlu1 %1794, %v891_v13  }
  0x52   : > { %906 = vperm.xlu2 %1795, %v892_v27  }
  0x55   : > { %637 = vmatpush.bf16.xpose.msra.mxu0 %v583_v25 }
  0x56   : > { %666 = vmatpush.bf16.xpose.msra.mxu1 %v607_v26 }
  0x58   : > { %1117 = vperm.xlu0 %1793, %v1083_v23   ;;  %1122 = vperm.xlu1 %1794, %v1084_v24  }
  0x5a   : > { %1107 = vperm.xlu2 %1795, %v1081_v31  }
  0x5c   : > { %1625 = vmatmul.msk.bf16.vlgmr.msra.gmra.mxu0 %vm569_vm0, %v1733_v28 }
  0x5d   : > { %1629 = vmatmul.msk.bf16.vlgmr.msra.gmra.mxu1 %vm569_vm0, %v1733_v28 }
  0x60   : > { %1112 = vperm.xlu0 %1793, %v1082_v29   ;;  %1097 = vperm.xlu1 %1794, %v1079_v30  }
  0x62   : > { %1102 = vperm.xlu2 %1795, %v1080_v34  }
  0x68   : > { %1087 = vperm.xlu0 %1793, %v1077_v32   ;;  %1092 = vperm.xlu1 %1794, %v1078_v33  }
  0x6a   : > { %1257 = vperm.xlu2 %1795, %v1247_v38  }
  0x6c   : > { %1626 = vmatmul.msk.bf16.gmra.mxu0 %vm569_vm0, %v1734_v35 }
  0x6d   : > { %1630 = vmatmul.msk.bf16.gmra.mxu1 %vm569_vm0, %v1734_v35 }
  0x70   : > { %1262 = vperm.xlu0 %1793, %v1248_v36   ;;  %1267 = vperm.xlu1 %1794, %v1249_v37  }
  0x72   : > { %1272 = vperm.xlu2 %1795, %v1250_v41  }
  0x74   : > { %v522_v7 = vpop.permute.xlu2 %521 }
  0x78   : > { %1277 = vperm.xlu0 %1793, %v1251_v39   ;;  %1427 = vperm.xlu1 %1794, %v1417_v40  }
  0x7a   : > { %1432 = vperm.xlu2 %1795, %v1418_v45  }
  0x7c   : > { %1627 = vmatmul.msk.bf16.gmra.mxu0 %vm569_vm0, %v1735_v42  ;;  %v527_v21 = vpop.permute.xlu2 %526 }
  0x7d   : > { %1631 = vmatmul.msk.bf16.gmra.mxu1 %vm569_vm0, %v1735_v42 }
  0x80   : > { %1282 = vperm.xlu0 %1793, %v1252_v43   ;;  %1437 = vperm.xlu1 %1794, %v1419_v44  }
  0x82   : > { %1287 = vperm.xlu2 %1795, %v1253_v48  }
  0x88   : > { %1442 = vperm.xlu0 %1793, %v1420_v46   ;;  %1292 = vperm.xlu1 %1794, %v1254_v47  }
  0x8a   : > { %1447 = vperm.xlu2 %1795, %v1421_v52   ;;  %v532_v3 = vpop.permute.xlu1 %531  ;;  %v542_v4 = vpop.permute.xlu0 %541 }
  0x8c   : > { %1628 = vmatmul.msk.bf16.gmra.mxu0 %vm569_vm0, %v1736_v49 }
  0x8d   : > { %1632 = vmatmul.msk.bf16.gmra.mxu1 %vm569_vm0, %v1736_v49 }
  0x90   : > { %1452 = vperm.xlu0 %1793, %v1422_v50   ;;  %1457 = vperm.xlu1 %1794, %v1423_v51  }
  0x92   : > { %1462 = vperm.xlu2 %1795, %v1424_v54   ;;  %v537_v8 = vpop.permute.xlu1 %536  ;;  %v547_v10 = vpop.permute.xlu0 %546 }
  0x98   : > { %1510 = vperm.xlu0 %1793, %v1507_v53  }
  0x9a   : > { %v517_v33 = vpop.permute.xlu1 %516  ;;  %v512_v39 = vpop.permute.xlu0 %511 }
  0xd9   : > { %v639_v55 = vpop.f32.mrf.mxu0 }
  0xda   : > { %v668_v56 = vpop.f32.mrf.mxu1  ;;  %v2254_v43 = vadd.f32 %v639_v55, %v512_v39  ;;  %v1737_v55 = vld [vmem:[%s2539_s3] sm:$0xff] }
  0xdb   : > { %v2257_v45 = vadd.f32 %v668_v56, %v512_v39  ;;  %v1738_v56 = vld [vmem:[%s2539_s3 + $0x8] sm:$0xff] }
  0xdc   : > { %v2551_v51 = vmax.f32 %v2254_v43, 0.0 }
  0xdd   : > { %v2550_v52 = vmax.f32 %v2257_v45, 0.0 }
  0xe1   : > { %v641_v57 = vpop.f32.mrf.mxu0 }
  0xe2   : > { %v670_v58 = vpop.f32.mrf.mxu1  ;;  %v2240_v36 = vadd.f32 %v641_v57, %v517_v33  ;;  %v1739_v57 = vld [vmem:[%s2539_s3 + $0x10] sm:$0xff] }
  0xe3   : > { %v2247_v40 = vadd.f32 %v670_v58, %v517_v33  ;;  %v1740_v58 = vld [vmem:[%s2539_s3 + $0x18] sm:$0xff] }
  0xe4   : > { %v2553_v47 = vmax.f32 %v2240_v36, 0.0 }
  0xe5   : > { %v2552_v49 = vmax.f32 %v2247_v40, 0.0 }
  0xe6   : > { %v712_v53 = vpack.c.bf16 %v2553_v47, %v2551_v51 }
  0xe7   : > { %v713_v54 = vpack.c.bf16 %v2552_v49, %v2550_v52 }
  0xe9   : > { %v644_v59 = vpop.f32.mrf.mxu0 }
  0xea   : > { %v673_v60 = vpop.f32.mrf.mxu1  ;;  %v2234_v31 = vadd.f32 %v644_v59, %v522_v7 }
  0xeb   : > { %v2237_v34 = vadd.f32 %v673_v60, %v522_v7  ;;  %v766_v7 = vpop.permute.xlu0 %765 }
  0xec   : > { %v2555_v44 = vmax.f32 %v2234_v31, 0.0 }
  0xed   : > { %v2554_v46 = vmax.f32 %v2237_v34, 0.0 }
  0xf1   : > { %v646_v61 = vpop.f32.mrf.mxu0 }
  0xf2   : > { %v675_v62 = vpop.f32.mrf.mxu1  ;;  %v2220_v25 = vadd.f32 %v646_v61, %v527_v21 }
  0xf3   : > { %v2227_v28 = vadd.f32 %v675_v62, %v527_v21  ;;  %v741_v21 = vpop.permute.xlu0 %740 }
  0xf4   : > { %v694_v37 = vmax.f32 %v2220_v25, 0.0 }
  0xf5   : > { %v2556_v41 = vmax.f32 %v2227_v28, 0.0 }
  0xf6   : > { %v714_v48 = vpack.c.bf16 %v694_v37, %v2555_v44 }
  0xf7   : > { %v715_v50 = vpack.c.bf16 %v2556_v41, %v2554_v46 }
  0xf9   : > { %v649_v63 = vpop.f32.mrf.mxu0 }
  0xfa   : > { %v678_v0 = vpop.f32.mrf.mxu1  ;;  %v2212_v18 = vadd.f32 %v649_v63, %v532_v3 }
  0xfb   : > { %v2216_v22 = vadd.f32 %v678_v0, %v532_v3 }
  0xfc   : > { %v696_v32 = vmax.f32 %v2212_v18, 0.0 }
  0xfd   : > { %v697_v35 = vmax.f32 %v2216_v22, 0.0 }
 0x101   : > { %v651_v1 = vpop.f32.mrf.mxu0 }
 0x102   : > { %v680_v2 = vpop.f32.mrf.mxu1  ;;  %v2204_v13 = vadd.f32 %v651_v1, %v537_v8 }
 0x103   : > { %v2208_v16 = vadd.f32 %v680_v2, %v537_v8  ;;  %v761_v8 = vpop.permute.xlu2 %760 }
 0x104   : > { %v698_v26 = vmax.f32 %v2204_v13, 0.0 }
 0x105   : > { %v699_v29 = vmax.f32 %v2208_v16, 0.0 }
 0x106   : > { %v716_v38 = vpack.c.bf16 %v698_v26, %v696_v32 }
 0x107   : > { %v717_v42 = vpack.c.bf16 %v699_v29, %v697_v35 }
 0x109   : > { %v654_v5 = vpop.f32.mrf.mxu0 }
 0x10a   : > { %v683_v6 = vpop.f32.mrf.mxu1  ;;  %v2200_v9 = vadd.f32 %v654_v5, %v542_v4 }
 0x10b   : > { %v2202_v11 = vadd.f32 %v683_v6, %v542_v4 }
 0x10c   : > { %v700_v19 = vmax.f32 %v2200_v9, 0.0 }
 0x10d   : > { %v701_v23 = vmax.f32 %v2202_v11, 0.0 }
 0x111   : > { %v656_v12 = vpop.f32.mrf.mxu0 }
 0x112   : > { %v2206_v14 = vadd.f32 %v656_v12, %v547_v10  ;;  %v685_v15 = vpop.f32.mrf.mxu1 }
 0x113   : > { %v2210_v17 = vadd.f32 %v685_v15, %v547_v10  ;;  %v751_v15 = vpop.permute.xlu1 %750 }
 0x114   : > { %v702_v20 = vmax.f32 %v2206_v14, 0.0 }
 0x115   : > { %v703_v24 = vmax.f32 %v2210_v17, 0.0 }
 0x116   : > { %v718_v27 = vpack.c.bf16 %v702_v20, %v700_v19 }
 0x117   : > { %v719_v30 = vpack.c.bf16 %v703_v24, %v701_v23 }
 0x118   : > { %805 = vmatpush.bf16.msra.mxu2 %v718_v27 }
 0x119   : > { %834 = vmatpush.bf16.msra.mxu3 %v719_v30  ;;  %v756_v30 = vpop.permute.xlu2 %755 }
 0x11c   : > { %806 = vmatpush.bf16.msra.mxu2 %v716_v38 }
 0x11d   : > { %835 = vmatpush.bf16.msra.mxu3 %v717_v42 }
 0x120   : > { %807 = vmatpush.bf16.msra.mxu2 %v714_v48 }
 0x121   : > { %836 = vmatpush.bf16.msra.mxu3 %v715_v50 }
 0x124   : > { %808 = vmatpush.bf16.msra.mxu2 %v712_v53 }
 0x125   : > { %837 = vmatpush.bf16.msra.mxu3 %v713_v54 }
 0x127   : > { %1649 = vmatmul.msk.bf16.vlgmr.msra.gmra.mxu2 %vm788_vm1, %v1737_v55 }
 0x128   : > { %1653 = vmatmul.msk.bf16.vlgmr.msra.gmra.mxu3 %vm788_vm1, %v1737_v55 }
 0x137   : > { %1650 = vmatmul.msk.bf16.gmra.mxu2 %vm788_vm1, %v1738_v56 }
 0x138   : > { %1654 = vmatmul.msk.bf16.gmra.mxu3 %vm788_vm1, %v1738_v56 }
 0x147   : > { %1651 = vmatmul.msk.bf16.gmra.mxu2 %vm788_vm1, %v1739_v57 }
 0x148   : > { %1655 = vmatmul.msk.bf16.gmra.mxu3 %vm788_vm1, %v1739_v57  ;;  %v746_v57 = vpop.permute.xlu1 %745 }
 0x157   : > { %1652 = vmatmul.msk.bf16.gmra.mxu2 %vm788_vm1, %v1740_v58 }
 0x158   : > { %1656 = vmatmul.msk.bf16.gmra.mxu3 %vm788_vm1, %v1740_v58 }
 0x1aa   : > { %v810_v59 = vpop.f32.mrf.mxu2 }
 0x1ab   : > { %v839_v60 = vpop.f32.mrf.mxu3 }
 0x1b2   : > { %v812_v61 = vpop.f32.mrf.mxu2 }
 0x1b3   : > { %v841_v62 = vpop.f32.mrf.mxu3 }
 0x1ba   : > { %v815_v63 = vpop.f32.mrf.mxu2 }
 0x1bb   : > { %v844_v0 = vpop.f32.mrf.mxu3 }
 0x1c2   : > { %v817_v1 = vpop.f32.mrf.mxu2 }
 0x1c3   : > { %v846_v2 = vpop.f32.mrf.mxu3  ;;  %v818_v49 = vadd.f32 %v817_v1, %v746_v57 }
 0x1c4   : > { %v847_v44 = vadd.f32 %v846_v2, %v746_v57 }
 0x1ca   : > { %v820_v3 = vpop.f32.mrf.mxu2 }
 0x1cb   : > { %v849_v4 = vpop.f32.mrf.mxu3  ;;  %v821_v54 = vadd.f32 %v820_v3, %v751_v15 }
 0x1cc   : > { %v850_v58 = vadd.f32 %v849_v4, %v751_v15  ;;  %v866_v15 = vmax.f32 %v847_v44, 0.0  ;;  %v1741_v44 = vld [vmem:[%s2541_s5] sm:$0xff] }
 0x1d2   : > { %v822_v5 = vpop.f32.mrf.mxu2 }
 0x1d3   : > { %v851_v6 = vpop.f32.mrf.mxu3  ;;  %v823_v39 = vadd.f32 %v822_v5, %v756_v30  ;;  %v736_v5 = vpop.permute.xlu0 %735 }
 0x1d4   : > { %v852_v50 = vadd.f32 %v851_v6, %v756_v30  ;;  %v868_v6 = vmax.f32 %v850_v58, 0.0  ;;  %v813_v3 = vadd.f32 %v812_v61, %v736_v5  ;;  %v731_v30 = vpop.permute.xlu2 %730  ;;  %v842_v4 = vadd.f32 %v841_v62, %v736_v5  ;;  %v1744_v61 = vld [vmem:[%s2541_s5 + $0x18] sm:$0xff]  ;;  %v932_v5 = vpop.permute.xlu1 %931 }
 0x1d5   : > { %v869_v47 = vmax.f32 %v823_v39, 0.0  ;;  %v811_v1 = vadd.f32 %v810_v59, %v731_v30  ;;  %v840_v2 = vadd.f32 %v839_v60, %v731_v30  ;;  %v1742_v59 = vld [vmem:[%s2541_s5 + $0x8] sm:$0xff]  ;;  %v1743_v60 = vld [vmem:[%s2541_s5 + $0x10] sm:$0xff] }
 0x1da   : > { %v825_v10 = vpop.f32.mrf.mxu2 }
 0x1db   : > { %v854_v12 = vpop.f32.mrf.mxu3  ;;  %v826_v27 = vadd.f32 %v825_v10, %v761_v8  ;;  %v870_v10 = vmax.f32 %v852_v50, 0.0 }
 0x1dc   : > { %v855_v33 = vadd.f32 %v854_v12, %v761_v8  ;;  %v816_v8 = vadd.f32 %v815_v63, %v741_v21  ;;  %v867_v12 = vmax.f32 %v821_v54, 0.0  ;;  %v927_v30 = vpop.permute.xlu1 %926 }
 0x1dd   : > { %v871_v55 = vmax.f32 %v826_v27, 0.0 }
 0x1de   : > { %v872_v52 = vmax.f32 %v855_v33, 0.0  ;;  %v887_v27 = vpack.c.bf16 %v869_v47, %v867_v12  ;;  %v888_v33 = vpack.c.bf16 %v870_v10, %v868_v6  ;;  %v863_v39 = vmax.f32 %v816_v8, 0.0  ;;  %v937_v12 = vpop.permute.xlu2 %936 }
 0x1e2   : > { %v827_v38 = vpop.f32.mrf.mxu2 }
 0x1e3   : > { %v828_v42 = vadd.f32 %v827_v38, %v766_v7  ;;  %v856_v48 = vpop.f32.mrf.mxu3  ;;  %v845_v38 = vadd.f32 %v844_v0, %v741_v21  ;;  %v859_v0 = vmax.f32 %v811_v1, 0.0 }
 0x1e4   : > { %v857_v53 = vadd.f32 %v856_v48, %v766_v7  ;;  %v865_v7 = vmax.f32 %v818_v49, 0.0 }
 0x1e5   : > { %v873_v56 = vmax.f32 %v828_v42, 0.0  ;;  %v864_v42 = vmax.f32 %v845_v38, 0.0  ;;  %v922_v38 = vpop.permute.xlu0 %921 }
 0x1e6   : > { %v874_v51 = vmax.f32 %v857_v53, 0.0 }
 0x1e7   : > { %v889_v46 = vpack.c.bf16 %v873_v56, %v871_v55  ;;  %v886_v63 = vpack.c.bf16 %v866_v15, %v864_v42 }
 0x1e8   : > { %v890_v41 = vpack.c.bf16 %v874_v51, %v872_v52  ;;  %v861_v51 = vmax.f32 %v813_v3, 0.0  ;;  %v885_v52 = vpack.c.bf16 %v865_v7, %v863_v39  ;;  %v912_v7 = vpop.permute.xlu2 %911 }
 0x1e9   : > { %975 = vmatpush.bf16.msrb.mxu2 %v889_v46  ;;  %v862_v46 = vmax.f32 %v842_v4, 0.0 }
 0x1ea   : > { %1004 = vmatpush.bf16.msrb.mxu3 %v890_v41  ;;  %v860_v41 = vmax.f32 %v840_v2, 0.0  ;;  %v883_v49 = vpack.c.bf16 %v861_v51, %v859_v0 }
 0x1ec   : > { %v884_v47 = vpack.c.bf16 %v862_v46, %v860_v41 }
 0x1ed   : > { %976 = vmatpush.bf16.msrb.mxu2 %v887_v27 }
 0x1ee   : > { %1005 = vmatpush.bf16.msrb.mxu3 %v888_v33 }
 0x1f1   : > { %977 = vmatpush.bf16.msrb.mxu2 %v885_v52  ;;  %v917_v52 = vpop.permute.xlu0 %916 }
 0x1f2   : > { %1006 = vmatpush.bf16.msrb.mxu3 %v886_v63 }
 0x1f5   : > { %978 = vmatpush.bf16.msrb.mxu2 %v883_v49 }
 0x1f6   : > { %1007 = vmatpush.bf16.msrb.mxu3 %v884_v47 }
 0x1f8   : > { %1673 = vmatmul.msk.bf16.vlgmr.msrb.gmra.mxu2 %vm788_vm1, %v1741_v44 }
 0x1f9   : > { %1677 = vmatmul.msk.bf16.vlgmr.msrb.gmra.mxu3 %vm788_vm1, %v1741_v44 }
 0x208   : > { %1674 = vmatmul.msk.bf16.gmra.mxu2 %vm788_vm1, %v1742_v59 }
 0x209   : > { %1678 = vmatmul.msk.bf16.gmra.mxu3 %vm788_vm1, %v1742_v59 }
 0x218   : > { %1675 = vmatmul.msk.bf16.gmra.mxu2 %vm788_vm1, %v1743_v60 }
 0x219   : > { %1679 = vmatmul.msk.bf16.gmra.mxu3 %vm788_vm1, %v1743_v60  ;;  %v902_v60 = vpop.permute.xlu1 %901 }
 0x228   : > { %1676 = vmatmul.msk.bf16.gmra.mxu2 %vm788_vm1, %v1744_v61 }
 0x229   : > { %1680 = vmatmul.msk.bf16.gmra.mxu3 %vm788_vm1, %v1744_v61 }
 0x27b   : > { %v980_v62 = vpop.f32.mrf.mxu2 }
 0x27c   : > { %v1009_v21 = vpop.f32.mrf.mxu3 }
 0x283   : > { %v982_v48 = vpop.f32.mrf.mxu2 }
 0x284   : > { %v1011_v50 = vpop.f32.mrf.mxu3 }
 0x28b   : > { %v985_v53 = vpop.f32.mrf.mxu2 }
 0x28c   : > { %v1014_v54 = vpop.f32.mrf.mxu3 }
 0x293   : > { %v987_v55 = vpop.f32.mrf.mxu2 }
 0x294   : > { %v1016_v56 = vpop.f32.mrf.mxu3  ;;  %v988_v41 = vadd.f32 %v987_v55, %v917_v52 }
 0x295   : > { %v1017_v9 = vadd.f32 %v1016_v56, %v917_v52 }
 0x296   : > { %v2358_v18 = vadd.f32 %v988_v41, %v694_v37  ;;  %v981_v37 = vadd.f32 %v980_v62, %v902_v60 }
 0x298   : > { %v1051_v62 = vmax.f32 %v2358_v18, 0.0 }
 0x29b   : > { %v990_v57 = vpop.f32.mrf.mxu2 }
 0x29c   : > { %v1019_v58 = vpop.f32.mrf.mxu3  ;;  %v991_v39 = vadd.f32 %v990_v57, %v922_v38 }
 0x29d   : > { %v1020_v46 = vadd.f32 %v1019_v58, %v922_v38  ;;  %v2573_v58 = vmax.f32 %v2240_v36, 0.0 }
 0x29e   : > { %v2346_v44 = vadd.f32 %v991_v39, %v696_v32  ;;  %v1746_v39 = vld [vmem:[%s2543_s7 + $0x8] sm:$0xff] }
 0x29f   : > { %v2352_v16 = vadd.f32 %v1020_v46, %v697_v35  ;;  %v2570_v35 = vmax.f32 %v2227_v28, 0.0  ;;  %v2572_v28 = vmax.f32 %v2237_v34, 0.0 }
 0x2a0   : > { %v1053_v55 = vmax.f32 %v2346_v44, 0.0 }
 0x2a1   : > { %v2367_v61 = vadd.f32 %v1017_v9, %v2570_v35  ;;  %v2563_v57 = vmax.f32 %v2352_v16, 0.0  ;;  %v1123_v35 = vpop.permute.xlu1 %1122 }
 0x2a3   : > { %v992_v10 = vpop.f32.mrf.mxu2  ;;  %v1052_v34 = vmax.f32 %v2367_v61, 0.0 }
 0x2a4   : > { %v1021_v8 = vpop.f32.mrf.mxu3  ;;  %v993_v15 = vadd.f32 %v992_v10, %v927_v30 }
 0x2a5   : > { %v1022_v33 = vadd.f32 %v1021_v8, %v927_v30 }
 0x2a6   : > { %v2330_v49 = vadd.f32 %v993_v15, %v698_v26  ;;  %v1015_v26 = vadd.f32 %v1014_v54, %v912_v7 }
 0x2a8   : > { %v2562_v32 = vmax.f32 %v2330_v49, 0.0  ;;  %v2381_v56 = vadd.f32 %v1015_v26, %v2572_v28 }
 0x2a9   : > { %v1098_v28 = vpop.permute.xlu1 %1097 }
 0x2ab   : > { %v995_v6 = vpop.f32.mrf.mxu2 }
 0x2ac   : > { %v1024_v3 = vpop.f32.mrf.mxu3  ;;  %v996_v27 = vadd.f32 %v995_v6, %v932_v5  ;;  %v2576_v6 = vmax.f32 %v2257_v45, 0.0 }
 0x2ad   : > { %v1025_v4 = vadd.f32 %v1024_v3, %v932_v5 }
 0x2ae   : > { %v2322_v2 = vadd.f32 %v996_v27, %v700_v19  ;;  %v2338_v19 = vadd.f32 %v1022_v33, %v699_v29 }
 0x2af   : > { %v2326_v63 = vadd.f32 %v1025_v4, %v701_v23  ;;  %v986_v23 = vadd.f32 %v985_v53, %v912_v7 }
 0x2b0   : > { %v2560_v13 = vmax.f32 %v2322_v2, 0.0  ;;  %v2561_v53 = vmax.f32 %v2338_v19, 0.0 }
 0x2b1   : > { %v2559_v29 = vmax.f32 %v2326_v63, 0.0 }
 0x2b2   : > { %v1074_v36 = vpack.c.bf16 %v2561_v53, %v2563_v57 }
 0x2b3   : > { %v997_v1 = vpop.f32.mrf.mxu2 }
 0x2b4   : > { %v998_v42 = vadd.f32 %v997_v1, %v937_v12  ;;  %v1026_v51 = vpop.f32.mrf.mxu3  ;;  %v1745_v1 = vld [vmem:[%s2543_s7] sm:$0xff] }
 0x2b5   : > { %v1027_v0 = vadd.f32 %v1026_v51, %v937_v12  ;;  %v2575_v12 = vmax.f32 %v2254_v43, 0.0  ;;  %v1748_v51 = vld [vmem:[%s2543_s7 + $0x18] sm:$0xff] }
 0x2b6   : > { %v2334_v47 = vadd.f32 %v998_v42, %v702_v20  ;;  %v907_v20 = vpop.permute.xlu2 %906  ;;  %v1747_v42 = vld [vmem:[%s2543_s7 + $0x10] sm:$0xff] }
 0x2b7   : > { %v2342_v11 = vadd.f32 %v1027_v0, %v703_v24  ;;  %v983_v24 = vadd.f32 %v982_v48, %v907_v20  ;;  %v1012_v22 = vadd.f32 %v1011_v50, %v907_v20  ;;  %v2571_v48 = vmax.f32 %v2234_v31, 0.0 }
 0x2b8   : > { %v2558_v14 = vmax.f32 %v2334_v47, 0.0  ;;  %v1010_v50 = vadd.f32 %v1009_v21, %v902_v60  ;;  %v1073_v31 = vpack.c.bf16 %v2562_v32, %v1053_v55  ;;  %v2574_v21 = vmax.f32 %v2247_v40, 0.0 }
 0x2b9   : > { %v2557_v17 = vmax.f32 %v2342_v11, 0.0  ;;  %v2376_v54 = vadd.f32 %v986_v23, %v2571_v48  ;;  %v2386_v10 = vadd.f32 %v983_v24, %v2573_v58  ;;  %v2404_v5 = vadd.f32 %v981_v37, %v2575_v12 }
 0x2ba   : > { %v1075_v59 = vpack.c.bf16 %v2558_v14, %v2560_v13  ;;  %v2395_v8 = vadd.f32 %v1012_v22, %v2574_v21  ;;  %v2409_v3 = vadd.f32 %v1010_v50, %v2576_v6  ;;  %v1050_v40 = vmax.f32 %v2381_v56, 0.0 }
 0x2bb   : > { %v1076_v25 = vpack.c.bf16 %v2557_v17, %v2559_v29  ;;  %v1049_v38 = vmax.f32 %v2376_v54, 0.0  ;;  %v1047_v7 = vmax.f32 %v2386_v10, 0.0  ;;  %v1045_v45 = vmax.f32 %v2404_v5, 0.0 }
 0x2bc   : > { %1161 = vmatpush.bf16.msrb.mxu0 %v1075_v59  ;;  %v1048_v43 = vmax.f32 %v2395_v8, 0.0  ;;  %v1072_v30 = vpack.c.bf16 %v1052_v34, %v1050_v40  ;;  %v1046_v4 = vmax.f32 %v2409_v3, 0.0 }
 0x2bd   : > { %1190 = vmatpush.bf16.msrb.mxu1 %v1076_v25  ;;  %v1071_v27 = vpack.c.bf16 %v1051_v62, %v1049_v38  ;;  %v1069_v15 = vpack.c.bf16 %v1047_v7, %v1045_v45  ;;  %v1118_v25 = vpop.permute.xlu0 %1117 }
 0x2be   : > { %v1070_v33 = vpack.c.bf16 %v1048_v43, %v1046_v4  ;;  %v1108_v50 = vpop.permute.xlu2 %1107 }
 0x2c0   : > { %1162 = vmatpush.bf16.msrb.mxu0 %v1073_v31 }
 0x2c1   : > { %1191 = vmatpush.bf16.msrb.mxu1 %v1074_v36 }
 0x2c4   : > { %1163 = vmatpush.bf16.msrb.mxu0 %v1071_v27 }
 0x2c5   : > { %1192 = vmatpush.bf16.msrb.mxu1 %v1072_v30  ;;  %v1113_v31 = vpop.permute.xlu0 %1112 }
 0x2c8   : > { %1164 = vmatpush.bf16.msrb.mxu0 %v1069_v15 }
 0x2c9   : > { %1193 = vmatpush.bf16.msrb.mxu1 %v1070_v33 }
 0x2cb   : > { %1697 = vmatmul.msk.bf16.vlgmr.msrb.gmra.mxu0 %vm788_vm1, %v1745_v1 }
 0x2cc   : > { %1701 = vmatmul.msk.bf16.vlgmr.msrb.gmra.mxu1 %vm788_vm1, %v1745_v1 }
 0x2db   : > { %1698 = vmatmul.msk.bf16.gmra.mxu0 %vm788_vm1, %v1746_v39 }
 0x2dc   : > { %1702 = vmatmul.msk.bf16.gmra.mxu1 %vm788_vm1, %v1746_v39 }
 0x2eb   : > { %1699 = vmatmul.msk.bf16.gmra.mxu0 %vm788_vm1, %v1747_v42 }
 0x2ec   : > { %1703 = vmatmul.msk.bf16.gmra.mxu1 %vm788_vm1, %v1747_v42  ;;  %v1103_v42 = vpop.permute.xlu2 %1102 }
 0x2fb   : > { %1700 = vmatmul.msk.bf16.gmra.mxu0 %vm788_vm1, %v1748_v51 }
 0x2fc   : > { %1704 = vmatmul.msk.bf16.gmra.mxu1 %vm788_vm1, %v1748_v51 }
 0x348   : > { %v1166_v52 = vpop.f32.mrf.mxu0 }
 0x349   : > { %v1195_v46 = vpop.f32.mrf.mxu1 }
 0x350   : > { %v1168_v0 = vpop.f32.mrf.mxu0 }
 0x351   : > { %v1197_v41 = vpop.f32.mrf.mxu1 }
 0x358   : > { %v1171_v9 = vpop.f32.mrf.mxu0 }
 0x359   : > { %v1200_v23 = vpop.f32.mrf.mxu1 }
 0x360   : > { %v1173_v20 = vpop.f32.mrf.mxu0 }
 0x361   : > { %v1202_v26 = vpop.f32.mrf.mxu1  ;;  %v1174_v29 = vadd.f32 %v1173_v20, %v1103_v42 }
 0x362   : > { %v1203_v32 = vadd.f32 %v1202_v26, %v1103_v42 }
 0x368   : > { %v1176_v24 = vpop.f32.mrf.mxu0 }
 0x369   : > { %v1205_v59 = vpop.f32.mrf.mxu1  ;;  %v1177_v33 = vadd.f32 %v1176_v24, %v1108_v50 }
 0x36a   : > { %v1206_v51 = vadd.f32 %v1205_v59, %v1108_v50  ;;  %v1222_v50 = vmax.f32 %v1203_v32, 0.0  ;;  %v1749_v32 = vld [vmem:[%s2545_s9] sm:$0xff] }
 0x370   : > { %v1178_v60 = vpop.f32.mrf.mxu0 }
 0x371   : > { %v1207_v22 = vpop.f32.mrf.mxu1  ;;  %v1179_v12 = vadd.f32 %v1178_v60, %v1113_v31  ;;  %v1093_v60 = vpop.permute.xlu1 %1092 }
 0x372   : > { %v1208_v30 = vadd.f32 %v1207_v22, %v1113_v31  ;;  %v1224_v22 = vmax.f32 %v1206_v51, 0.0  ;;  %v1169_v24 = vadd.f32 %v1168_v0, %v1093_v60  ;;  %v1088_v31 = vpop.permute.xlu0 %1087  ;;  %v1198_v59 = vadd.f32 %v1197_v41, %v1093_v60  ;;  %v1752_v0 = vld [vmem:[%s2545_s9 + $0x18] sm:$0xff] }
 0x373   : > { %v1225_v13 = vmax.f32 %v1179_v12, 0.0  ;;  %v1167_v20 = vadd.f32 %v1166_v52, %v1088_v31  ;;  %v1196_v26 = vadd.f32 %v1195_v46, %v1088_v31  ;;  %v1750_v52 = vld [vmem:[%s2545_s9 + $0x8] sm:$0xff]  ;;  %v1751_v46 = vld [vmem:[%s2545_s9 + $0x10] sm:$0xff] }
 0x378   : > { %v1181_v37 = vpop.f32.mrf.mxu0 }
 0x379   : > { %v1210_v48 = vpop.f32.mrf.mxu1  ;;  %v1182_v58 = vadd.f32 %v1181_v37, %v1118_v25  ;;  %v1226_v37 = vmax.f32 %v1208_v30, 0.0  ;;  %v1268_v42 = vpop.permute.xlu1 %1267 }
 0x37a   : > { %v1211_v21 = vadd.f32 %v1210_v48, %v1118_v25  ;;  %v1172_v25 = vadd.f32 %v1171_v9, %v1098_v28  ;;  %v1223_v48 = vmax.f32 %v1177_v33, 0.0  ;;  %v1263_v33 = vpop.permute.xlu0 %1262 }
 0x37b   : > { %v1227_v1 = vmax.f32 %v1182_v58, 0.0 }
 0x37c   : > { %v1228_v17 = vmax.f32 %v1211_v21, 0.0  ;;  %v1243_v58 = vpack.c.bf16 %v1225_v13, %v1223_v48  ;;  %v1244_v21 = vpack.c.bf16 %v1226_v37, %v1224_v22  ;;  %v1219_v12 = vmax.f32 %v1172_v25, 0.0 }
 0x380   : > { %v1183_v36 = vpop.f32.mrf.mxu0 }
 0x381   : > { %v1184_v6 = vadd.f32 %v1183_v36, %v1123_v35  ;;  %v1212_v27 = vpop.f32.mrf.mxu1  ;;  %v1201_v36 = vadd.f32 %v1200_v23, %v1098_v28  ;;  %v1215_v23 = vmax.f32 %v1167_v20, 0.0  ;;  %v1428_v60 = vpop.permute.xlu1 %1427 }
 0x382   : > { %v1213_v15 = vadd.f32 %v1212_v27, %v1123_v35  ;;  %v1221_v35 = vmax.f32 %v1174_v29, 0.0  ;;  %v1278_v48 = vpop.permute.xlu0 %1277 }
 0x383   : > { %v1229_v39 = vmax.f32 %v1184_v6, 0.0  ;;  %v1220_v6 = vmax.f32 %v1201_v36, 0.0 }
 0x384   : > { %v1230_v14 = vmax.f32 %v1213_v15, 0.0  ;;  %v1258_v15 = vpop.permute.xlu2 %1257 }
 0x385   : > { %v1245_v53 = vpack.c.bf16 %v1229_v39, %v1227_v1  ;;  %v1242_v9 = vpack.c.bf16 %v1222_v50, %v1220_v6 }
 0x386   : > { %v1246_v57 = vpack.c.bf16 %v1230_v14, %v1228_v17  ;;  %v1217_v14 = vmax.f32 %v1169_v24, 0.0  ;;  %v1241_v17 = vpack.c.bf16 %v1221_v35, %v1219_v12 }
 0x387   : > { %1331 = vmatpush.bf16.msra.mxu2 %v1245_v53  ;;  %v1218_v53 = vmax.f32 %v1198_v59, 0.0 }
 0x388   : > { %1360 = vmatpush.bf16.msra.mxu3 %v1246_v57  ;;  %v1216_v57 = vmax.f32 %v1196_v26, 0.0  ;;  %v1239_v29 = vpack.c.bf16 %v1217_v14, %v1215_v23 }
 0x389   : > { %v1438_v31 = vpop.permute.xlu1 %1437 }
 0x38a   : > { %v1240_v13 = vpack.c.bf16 %v1218_v53, %v1216_v57  ;;  %v1283_v35 = vpop.permute.xlu0 %1282 }
 0x38b   : > { %1332 = vmatpush.bf16.msra.mxu2 %v1243_v58 }
 0x38c   : > { %1361 = vmatpush.bf16.msra.mxu3 %v1244_v21  ;;  %v1273_v51 = vpop.permute.xlu2 %1272 }
 0x38f   : > { %1333 = vmatpush.bf16.msra.mxu2 %v1241_v17 }
 0x390   : > { %1362 = vmatpush.bf16.msra.mxu3 %v1242_v9 }
 0x393   : > { %1334 = vmatpush.bf16.msra.mxu2 %v1239_v29 }
 0x394   : > { %1363 = vmatpush.bf16.msra.mxu3 %v1240_v13  ;;  %v1433_v36 = vpop.permute.xlu2 %1432 }
 0x396   : > { %1721 = vmatmul.msk.bf16.vlgmr.msra.gmra.mxu2 %vm788_vm1, %v1749_v32 }
 0x397   : > { %1725 = vmatmul.msk.bf16.vlgmr.msra.gmra.mxu3 %vm788_vm1, %v1749_v32 }
 0x39c   : > { %v1288_v53 = vpop.permute.xlu2 %1287 }
 0x3a6   : > { %1722 = vmatmul.msk.bf16.gmra.mxu2 %vm788_vm1, %v1750_v52 }
 0x3a7   : > { %1726 = vmatmul.msk.bf16.gmra.mxu3 %vm788_vm1, %v1750_v52 }
 0x3b6   : > { %1723 = vmatmul.msk.bf16.gmra.mxu2 %vm788_vm1, %v1751_v46 }
 0x3b7   : > { %1727 = vmatmul.msk.bf16.gmra.mxu3 %vm788_vm1, %v1751_v46  ;;  %v1443_v46 = vpop.permute.xlu0 %1442 }
 0x3c6   : > { %1724 = vmatmul.msk.bf16.gmra.mxu2 %vm788_vm1, %v1752_v0 }
 0x3c7   : > { %1728 = vmatmul.msk.bf16.gmra.mxu3 %vm788_vm1, %v1752_v0 }
 0x419   : > { %v1336_v41 = vpop.f32.mrf.mxu2 }
 0x41a   : > { %v1365_v28 = vpop.f32.mrf.mxu3  ;;  %v1337_v50 = vadd.f32 %v1336_v41, %v1258_v15  ;;  %v2577_v41 = vmax.f32 %v2352_v16, 0.0  ;;  %v2580_v16 = vmax.f32 %v2322_v2, 0.0 }
 0x41b   : > { %v1366_v20 = vadd.f32 %v1365_v28, %v1258_v15 }
 0x41c   : > { %v1385_v57 = vadd.f32 %v1337_v50, %v1045_v45 }
 0x41d   : > { %v1386_v32 = vadd.f32 %v1366_v20, %v1046_v4  ;;  %v1293_v4 = vpop.permute.xlu1 %1292 }
 0x41f   : > { %v1402_v56 = vmax.f32 %v1386_v32, 0.0 }
 0x421   : > { %v1338_v27 = vpop.f32.mrf.mxu2 }
 0x422   : > { %v1367_v30 = vpop.f32.mrf.mxu3  ;;  %v1339_v58 = vadd.f32 %v1338_v27, %v1263_v33 }
 0x423   : > { %v1368_v59 = vadd.f32 %v1367_v30, %v1263_v33  ;;  %v2578_v30 = vmax.f32 %v2330_v49, 0.0  ;;  %v2581_v49 = vmax.f32 %v2326_v63, 0.0 }
 0x424   : > { %v1387_v6 = vadd.f32 %v1339_v58, %v1047_v7 }
 0x425   : > { %v1388_v9 = vadd.f32 %v1368_v59, %v1048_v43  ;;  %v1458_v63 = vpop.permute.xlu1 %1457 }
 0x426   : > { %v1403_v52 = vmax.f32 %v1387_v6, 0.0 }
 0x427   : > { %v1404_v0 = vmax.f32 %v1388_v9, 0.0 }
 0x429   : > { %v1341_v1 = vpop.f32.mrf.mxu2  ;;  %v1468_v33 = vmul.f32 %v1433_v36, %v1404_v0  ;;  %v2583_v0 = vmax.f32 %v2342_v11, 0.0 }
 0x42a   : > { %v1370_v39 = vpop.f32.mrf.mxu3  ;;  %v1342_v21 = vadd.f32 %v1341_v1, %v1268_v42 }
 0x42b   : > { %v1371_v12 = vadd.f32 %v1370_v39, %v1268_v42  ;;  %v2579_v39 = vmax.f32 %v2338_v19, 0.0 }
 0x42c   : > { %v1389_v29 = vadd.f32 %v1342_v21, %v1049_v38  ;;  %v1401_v38 = vmax.f32 %v1385_v57, 0.0 }
 0x42d   : > { %v1390_v10 = vadd.f32 %v1371_v12, %v1050_v40 }
 0x42e   : > { %v1405_v45 = vmax.f32 %v1389_v29, 0.0  ;;  %v1465_v42 = vmul.f32 %v1428_v60, %v1401_v38 }
 0x42f   : > { %v1406_v40 = vmax.f32 %v1390_v10, 0.0 }
 0x431   : > { %v1343_v37 = vpop.f32.mrf.mxu2 }
 0x432   : > { %v1372_v25 = vpop.f32.mrf.mxu3  ;;  %v1344_v14 = vadd.f32 %v1343_v37, %v1273_v51 }
 0x433   : > { %v1373_v23 = vadd.f32 %v1372_v25, %v1273_v51  ;;  %v1469_v51 = vmul.f32 %v1438_v31, %v1405_v45 }
 0x434   : > { %v1391_v8 = vadd.f32 %v1344_v14, %v1051_v62  ;;  %v1467_v62 = vmul.f32 %v1433_v36, %v1403_v52  ;;  %v1453_v14 = vpop.permute.xlu0 %1452  ;;  %v2582_v52 = vmax.f32 %v2334_v47, 0.0 }
 0x435   : > { %v1392_v5 = vadd.f32 %v1373_v23, %v1052_v34 }
 0x436   : > { %v1407_v27 = vmax.f32 %v1391_v8, 0.0  ;;  %v1481_v59 = vadd.f32 %v1467_v62, %v1465_v42 }
 0x437   : > { %v1408_v1 = vmax.f32 %v1392_v5, 0.0 }
 0x438   : > { %v1471_v36 = vmul.f32 %v1443_v46, %v1407_v27  ;;  %v1482_v12 = vadd.f32 %v1481_v59, %v1469_v51 }
 0x439   : > { %v1346_v22 = vpop.f32.mrf.mxu2  ;;  %v1472_v19 = vmul.f32 %v1443_v46, %v1408_v1 }
 0x43a   : > { %v1375_v24 = vpop.f32.mrf.mxu3  ;;  %v1347_v13 = vadd.f32 %v1346_v22, %v1278_v48  ;;  %v1466_v22 = vmul.f32 %v1428_v60, %v1402_v56  ;;  %v1483_v60 = vadd.f32 %v1482_v12, %v1471_v36 }
 0x43b   : > { %v1376_v7 = vadd.f32 %v1375_v24, %v1278_v48  ;;  %v1448_v48 = vpop.permute.xlu2 %1447  ;;  %v1470_v24 = vmul.f32 %v1438_v31, %v1406_v40 }
 0x43c   : > { %v1393_v3 = vadd.f32 %v1347_v13, %v1053_v55  ;;  %v1494_v21 = vadd.f32 %v1468_v33, %v1466_v22  ;;  %v1511_v1 = vpop.permute.xlu0 %1510 }
 0x43d   : > { %v1394_v28 = vadd.f32 %v1376_v7, %v2577_v41 }
 0x43e   : > { %v1409_v37 = vmax.f32 %v1393_v3, 0.0 }
 0x441   : > { %v1348_v26 = vpop.f32.mrf.mxu2 }
 0x442   : > { %v1377_v17 = vpop.f32.mrf.mxu3  ;;  %v1349_v43 = vadd.f32 %v1348_v26, %v1283_v35  ;;  %v1473_v26 = vmul.f32 %v1448_v48, %v1409_v37  ;;  %v1522_v37 = vlaneseq }
 0x443   : > { %v1378_v54 = vadd.f32 %v1377_v17, %v1283_v35  ;;  %v1410_v35 = vmax.f32 %v1394_v28, 0.0  ;;  %v1495_v17 = vadd.f32 %v1494_v21, %v1470_v24  ;;  %v1463_v45 = vpop.permute.xlu2 %1462 }
 0x444   : > { %v1395_v15 = vadd.f32 %v1349_v43, %v2578_v30  ;;  %v1484_v10 = vadd.f32 %v1483_v60, %v1473_v26  ;;  %vm1524_vm3 = vcmp.lt.s32.totalorder %v1522_v37, 256 }
 0x445   : > { %v1396_v44 = vadd.f32 %v1378_v54, %v2579_v39  ;;  %v1474_v2 = vmul.f32 %v1448_v48, %v1410_v35  ;;  %v1496_v29 = vadd.f32 %v1495_v17, %v1472_v19 }
 0x446   : > { %v1411_v50 = vmax.f32 %v1395_v15, 0.0 }
 0x447   : > { %v1412_v20 = vmax.f32 %v1396_v44, 0.0  ;;  %v1497_v43 = vadd.f32 %v1496_v29, %v1474_v2 }
 0x448   : > { %v1475_v31 = vmul.f32 %v1453_v14, %v1411_v50 }
 0x449   : > { %v1351_v18 = vpop.f32.mrf.mxu2  ;;  %v1476_v13 = vmul.f32 %v1453_v14, %v1412_v20 }
 0x44a   : > { %v1352_v61 = vadd.f32 %v1351_v18, %v1288_v53  ;;  %v1380_v34 = vpop.f32.mrf.mxu3  ;;  %v1485_v54 = vadd.f32 %v1484_v10, %v1475_v31 }
 0x44b   : > { %v1381_v55 = vadd.f32 %v1380_v34, %v1288_v53  ;;  %v1498_v3 = vadd.f32 %v1497_v43, %v1476_v13 }
 0x44c   : > { %v1397_v25 = vadd.f32 %v1352_v61, %v2580_v16 }
 0x44d   : > { %v1398_v58 = vadd.f32 %v1381_v55, %v2581_v49  ;;  %v1513_v55 = vperm.slane %v1511_v1, 0 }
 0x44e   : > { %v1413_v6 = vmax.f32 %v1397_v25, 0.0 }
 0x44f   : > { %v1414_v53 = vmax.f32 %v1398_v58, 0.0 }
 0x450   : > { %v1477_v7 = vmul.f32 %v1458_v63, %v1413_v6 }
 0x451   : > { %v1353_v9 = vpop.f32.mrf.mxu2  ;;  %v1478_v46 = vmul.f32 %v1458_v63, %v1414_v53 }
 0x452   : > { %v1354_v23 = vadd.f32 %v1353_v9, %v1293_v4  ;;  %v1382_v57 = vpop.f32.mrf.mxu3  ;;  %v1486_v40 = vadd.f32 %v1485_v54, %v1477_v7 }
 0x453   : > { %v1383_v32 = vadd.f32 %v1382_v57, %v1293_v4  ;;  %v1499_v4 = vadd.f32 %v1498_v3, %v1478_v46 }
 0x454   : > { %v1399_v8 = vadd.f32 %v1354_v23, %v2582_v52 }
 0x455   : > { %v1400_v5 = vadd.f32 %v1383_v32, %v2583_v0 }
 0x456   : > { %v1415_v38 = vmax.f32 %v1399_v8, 0.0 }
 0x457   : > { %v1416_v56 = vmax.f32 %v1400_v5, 0.0 }
 0x458   : > { %v1479_v41 = vmul.f32 %v1463_v45, %v1415_v38 }
 0x459   : > { %v1480_v28 = vmul.f32 %v1463_v45, %v1416_v56 }
 0x45a   : > { %v1487_v18 = vadd.f32 %v1486_v40, %v1479_v41 }
 0x45b   : > { %v1500_v62 = vadd.f32 %v1499_v4, %v1480_v28 }
 0x45c   : > { %v1488_v47 = vrot.slane %v1487_v18, 4 }
 0x45d   : > { %v1501_v27 = vrot.slane %v1500_v62, 4 }
 0x45e   : > { %v1489_v30 = vadd.f32 %v1488_v47, %v1487_v18 }
 0x45f   : > { %v1502_v15 = vadd.f32 %v1501_v27, %v1500_v62 }
 0x460   : > { %v1490_v61 = vrot.slane %v1489_v30, 2 }
 0x461   : > { %v1503_v11 = vrot.slane %v1502_v15, 2 }
 0x462   : > { %v1491_v34 = vadd.f32 %v1490_v61, %v1489_v30 }
 0x463   : > { %v1504_v33 = vadd.f32 %v1503_v11, %v1502_v15 }
 0x464   : > { %v1492_v39 = vrot.slane %v1491_v34, 1 }
 0x465   : > { %v1505_v44 = vrot.slane %v1504_v33, 1 }
 0x466   : > { %v1493_v42 = vadd.f32 %v1492_v39, %v1491_v34 }
 0x467   : > { %v1506_v51 = vadd.f32 %v1505_v44, %v1504_v33 }
 0x468   : > { %v1514_v25 = vadd.f32 %v1513_v55, %v1493_v42 }
 0x469   : > { %v1515_v16 = vadd.f32 %v1513_v55, %v1506_v51 }
 0x46b   : > { %v1518_v48 = vrot.slane %v1515_v16, 7 }
 0x46d   : > { %v1520_v22 = vsel %vm1519_vm2, %v1514_v25, %v1518_v48 }
 0x46e   : > { %1526 = vst.msk [vmem:[%s436_s21] sm:$0x3] %vm1524_vm3, %v1520_v22 }
 0x46f   : > { %1823 = shalt.err (!%p1820_p3)
}
 0x470   : > { %1753 = dma.vmem_to_hbm [thread:$0]  (%p1972_p5), %s1541_s22, 32, %s1543_s0, %s1528_s12  }
 0x471 PF: > { %p1759_p4 = scmp.ge.s32.totalorder %s1858_s30, 2  ;;  %s1554_s25 = sand.u32 1, %s1846_s27  }
 0x472   : > { %s1555_s21 = scalar_lea.sflag [#allocation4], %s1554_s25 }
 0x473   : > { %p1756_p7 = pnand %p1759_p4, %p1976_p6 }
 0x475   : > { %p1757_p8 = pneg %p1756_p7 }
 0x477   : > { %1841 = dma.done.wait (%p1757_p8), %s1555_s21, 32  }
 0x478   : > { %1843 = vsyncadd (%p1757_p8), %s1555_s21, 4294967264  ;;  %p25_p9 = scmp.ge.s32.totalorder %s1959_s15, 4   ;;  %s2584_s27 = smov %s1850_s28 }
 0x479   : > { %s2585_s28 = smov %s1854_s29  ;;  %s2586_s29 = smov %s1970_s18 }
 0x47a   : > { %s2587_s30 = smov %s1959_s15  ;;  %27 = sbr.rel (!%p25_p9) target bundleno = 6 (0x6), region = 107 }
 0x47f   :  { %1561 = vsyncpa [#allocation4], 1 }
 0x480   :  { %1563 = vsyncpa [#allocation4 + $0x1], 1 }

</bundles_post_ra>
